<compile_context>
chip_gen: v6e
topology: v6e:2x2x1
jax: 0.10.0
libtpu: 0.0.40
codegen_flags: <defaults>
</compile_context>

<pallas_src>
import functools

import jax
import jax.numpy as jnp
from jax import lax
from jax.experimental import pallas as pl
from jax.experimental.pallas import tpu as pltpu


def _kd_partial_kernel(s_ref, t_ref, o_ref, *, batch_size: int, tile_rows: int,
                       needs_mask: bool):
    """Per-tile partial sums: lane 0 -> sum((s-t)^2), lane 1 -> sum(1 - cos)."""
    i = pl.program_id(0)

    s = s_ref[...].astype(jnp.float32)              # (TB, D)
    t = t_ref[...].astype(jnp.float32)

    # Direct squared-error reduction (numerically safe when s ~= t).
    d = s - t
    sq_rows = jnp.sum(d * d, axis=-1, keepdims=True)     # (TB, 1)

    # Row reductions for the cosine term.
    ss = jnp.sum(s * s, axis=-1, keepdims=True)
    tt = jnp.sum(t * t, axis=-1, keepdims=True)
    st = jnp.sum(s * t, axis=-1, keepdims=True)

    # CosineEmbeddingLoss (target=+1): cos = <s,t> * rsqrt((||s||^2+eps)(||t||^2+eps))
    eps = jnp.float32(1e-12)
    cos = st * lax.rsqrt((ss + eps) * (tt + eps))
    cos_rows = jnp.float32(1.0) - cos                     # (TB, 1)

    if needs_mask:
        # Only emitted when B % TB != 0; interior tiles are all-valid anyway.
        row = lax.broadcasted_iota(jnp.int32, (tile_rows, 1), 0) + i * tile_rows
        valid = row < batch_size
        sq_rows = jnp.where(valid, sq_rows, 0.0)
        cos_rows = jnp.where(valid, cos_rows, 0.0)

    sq_sum = jnp.sum(sq_rows)
    cos_sum = jnp.sum(cos_rows)

    # Lane/sublane-aligned (1, 8, 128) output block:
    #   lane 0 -> squared-diff partial, lane 1 -> cosine partial, rest zero.
    lane = lax.broadcasted_iota(jnp.int32, (8, 128), 1)
    vec = jnp.where(lane == 0, sq_sum, jnp.where(lane == 1, cos_sum, 0.0))
    o_ref[...] = vec[None, :, :]


def _vmem_capacity_bytes() -> int:
    """Physical VMEM per TensorCore; conservative fallback = 64 MiB (v7x)."""
    try:
        return int(pltpu.get_tpu_info().vmem_capacity_bytes)
    except Exception:
        return 64 * 1024 * 1024


def knowledge_distillation_loss(student_embeddings, teacher_embeddings,
                                temperature: float = 4.0, alpha: float = 0.7,
                                tile_rows=None):
    """Pallas equivalent of KnowledgeDistillationLoss.forward. Returns scalar f32."""
    del temperature  # stored by the torch module but unused in forward
    assert student_embeddings.shape == teacher_embeddings.shape
    assert student_embeddings.ndim == 2
    B, D = student_embeddings.shape
    itemsize = jnp.dtype(student_embeddings.dtype).itemsize

    # Sublane packing: 8 rows for 32-bit dtypes, 16 for bf16, 32 for int8/fp8.
    packing = max(8, 32 // max(1, itemsize))

    # --- per-generation VMEM envelope ------------------------------------
    # Per-row working-set cost: 2 inputs x 2 pipeline buffers in the source
    # dtype PLUS ~4 full-tile f32 temporaries (upcasts, diff, products).
    bytes_per_row = D * (4 * itemsize + 4 * 4)
    vmem_cap = _vmem_capacity_bytes()
    if vmem_cap <= 80 * 1024 * 1024:           # v7x-class part (64 MiB / TC)
        budget = 24 * 1024 * 1024
        vmem_limit = 40 * 1024 * 1024
        row_cap = 2048
    else:                                      # v5e / v6e (128 MiB)
        budget = 44 * 1024 * 1024
        vmem_limit = 88 * 1024 * 1024
        row_cap = 4096

    # --- tile-rows heuristic ----------------------------------------------
    if tile_rows is None:
        tb = int(budget // bytes_per_row)
        tb = max(packing, min(tb, row_cap))
    else:
        tb = max(packing, int(tile_rows))
    tb = (tb // packing) * packing

    padded_B = ((B + packing - 1) // packing) * packing
    if tile_rows is None and padded_B >= 2 * packing:
        # Guarantee >= 2 grid steps so both v7x TensorCores get work.
        half = ((pl.cdiv(B, 2) + packing - 1) // packing) * packing
        tb = min(tb, half)
    tb = min(tb, padded_B)
    tb = max(tb, packing)

    num_tiles = pl.cdiv(B, tb)
    needs_mask = (B % tb) != 0

    kernel = functools.partial(_kd_partial_kernel, batch_size=B,
                               tile_rows=tb, needs_mask=needs_mask)

    partials = pl.pallas_call(
        kernel,
        out_shape=jax.ShapeDtypeStruct((num_tiles, 8, 128), jnp.float32),
        grid=(num_tiles,),
        in_specs=[
            pl.BlockSpec((tb, D), lambda i: (i, 0)),
            pl.BlockSpec((tb, D), lambda i: (i, 0)),
        ],
        out_specs=pl.BlockSpec((1, 8, 128), lambda i: (i, 0, 0)),
        compiler_params=pltpu.CompilerParams(
            dimension_semantics=("parallel",),   # shard tiles across TCs (v7x)
            vmem_limit_bytes=vmem_limit,
        ),
    )(student_embeddings, teacher_embeddings)

    # Tiny final reduction + alpha mix outside the kernel (alpha not baked in).
    sq_total = jnp.sum(partials[:, 0, 0])
    cos_total = jnp.sum(partials[:, 0, 1])
    mse = sq_total / jnp.float32(B * D)
    cosine_loss = cos_total / jnp.float32(B)
    a = jnp.float32(alpha)
    return a * mse + (jnp.float32(1.0) - a) * cosine_loss


def _reference(s, t, alpha=0.7):
    """Pure-JAX mirror of the torch module (MSELoss + CosineEmbeddingLoss)."""
    s = s.astype(jnp.float32)
    t = t.astype(jnp.float32)
    mse = jnp.mean((s - t) ** 2)
    eps = 1e-12
    dot = jnp.sum(s * t, axis=-1)
    ss = jnp.sum(s * s, axis=-1)
    tt = jnp.sum(t * t, axis=-1)
    cos = dot / jnp.sqrt((ss + eps) * (tt + eps))
    cosine = jnp.mean(1.0 - cos)
    return alpha * mse + (1 - alpha) * cosine


if __name__ == "__main__":
    key = jax.random.PRNGKey(0)
    k1, k2 = jax.random.split(key)
    # B not a multiple of the tile -> exercises multi-tile grid + row masking.
    B, D = 100, 256
    student = jax.random.normal(k1, (B, D), dtype=jnp.float32)
    teacher = student + 0.1 * jax.random.normal(k2, (B, D), dtype=jnp.float32)

    ref = _reference(student, teacher, alpha=0.7)

    # 1) auto tile-size heuristic (>= 2 tiles, partial last tile)
    loss_auto = knowledge_distillation_loss(student, teacher,
                                            temperature=4.0, alpha=0.7)
    loss_auto = jax.block_until_ready(loss_auto)
    assert jnp.allclose(loss_auto, ref, rtol=1e-4, atol=1e-6), (loss_auto, ref)

    # 2) explicit small tile (more grid steps + masking path)
    loss_32 = knowledge_distillation_loss(student, teacher,
                                          temperature=4.0, alpha=0.7,
                                          tile_rows=32)
    loss_32 = jax.block_until_ready(loss_32)
    assert jnp.allclose(loss_32, ref, rtol=1e-4, atol=1e-6), (loss_32, ref)

    print("KERNEL_OK")
</pallas_src>

<mosaic_0001>
module attributes {stable_mosaic.version = 11 : i64} {
  func.func @_kd_partial_kernel(%arg0: i32, %arg1: memref<56x256xf32, #tpu.memory_space<vmem>>, %arg2: memref<56x256xf32, #tpu.memory_space<vmem>>, %arg3: memref<1x8x128xf32, #tpu.memory_space<vmem>>) attributes {dimension_semantics = [#tpu.dimension_semantics<parallel>], iteration_bounds = array<i64: 2>, scalar_prefetch = 0 : i64, scratch_operands = 0 : i64, tpu.core_type = #tpu.core_type<tc>, window_params = [{transform_indices = @transform_0, window_bounds = array<i64: 56, 256>}, {transform_indices = @transform_1, window_bounds = array<i64: 56, 256>}, {transform_indices = @transform_2, window_bounds = array<i64: 1, 8, 128>}]} {
    %c0 = arith.constant 0 : index
    %c0_0 = arith.constant 0 : index
    %0 = vector.load %arg1[%c0, %c0_0] : memref<56x256xf32, #tpu.memory_space<vmem>>, vector<56x256xf32>
    %c0_1 = arith.constant 0 : index
    %c0_2 = arith.constant 0 : index
    %1 = vector.load %arg2[%c0_1, %c0_2] : memref<56x256xf32, #tpu.memory_space<vmem>>, vector<56x256xf32>
    %2 = arith.subf %0, %1 : vector<56x256xf32>
    %3 = arith.mulf %2, %2 : vector<56x256xf32>
    %cst = arith.constant dense<0.000000e+00> : vector<56xf32>
    %4 = vector.multi_reduction <add>, %3, %cst [1] : vector<56x256xf32> to vector<56xf32>
    %5 = vector.shape_cast %4 : vector<56xf32> to vector<56x1xf32>
    %6 = arith.mulf %0, %0 : vector<56x256xf32>
    %cst_3 = arith.constant dense<0.000000e+00> : vector<56xf32>
    %7 = vector.multi_reduction <add>, %6, %cst_3 [1] : vector<56x256xf32> to vector<56xf32>
    %8 = vector.shape_cast %7 : vector<56xf32> to vector<56x1xf32>
    %9 = arith.mulf %1, %1 : vector<56x256xf32>
    %cst_4 = arith.constant dense<0.000000e+00> : vector<56xf32>
    %10 = vector.multi_reduction <add>, %9, %cst_4 [1] : vector<56x256xf32> to vector<56xf32>
    %11 = vector.shape_cast %10 : vector<56xf32> to vector<56x1xf32>
    %12 = arith.mulf %0, %1 : vector<56x256xf32>
    %cst_5 = arith.constant dense<0.000000e+00> : vector<56xf32>
    %13 = vector.multi_reduction <add>, %12, %cst_5 [1] : vector<56x256xf32> to vector<56xf32>
    %14 = vector.shape_cast %13 : vector<56xf32> to vector<56x1xf32>
    %cst_6 = arith.constant 9.99999996E-13 : f32
    %15 = vector.broadcast %cst_6 : f32 to vector<56x1xf32>
    %16 = arith.addf %8, %15 : vector<56x1xf32>
    %cst_7 = arith.constant 9.99999996E-13 : f32
    %17 = vector.broadcast %cst_7 : f32 to vector<56x1xf32>
    %18 = arith.addf %11, %17 : vector<56x1xf32>
    %19 = arith.mulf %16, %18 : vector<56x1xf32>
    %20 = math.rsqrt %19 : vector<56x1xf32>
    %21 = arith.mulf %14, %20 : vector<56x1xf32>
    %cst_8 = arith.constant 1.000000e+00 : f32
    %22 = vector.broadcast %cst_8 : f32 to vector<56x1xf32>
    %23 = arith.subf %22, %21 : vector<56x1xf32>
    %24 = tpu.iota {dimensions = array<i32: 0>} : vector<56x1xi32>
    %c56_i32 = arith.constant 56 : i32
    %25 = arith.muli %arg0, %c56_i32 : i32
    %26 = vector.broadcast %25 : i32 to vector<56x1xi32>
    %27 = arith.addi %24, %26 : vector<56x1xi32>
    %c100_i32 = arith.constant 100 : i32
    %28 = vector.broadcast %c100_i32 : i32 to vector<56x1xi32>
    %29 = arith.cmpi slt, %27, %28 : vector<56x1xi32>
    %cst_9 = arith.constant 0.000000e+00 : f32
    %30 = vector.broadcast %cst_9 : f32 to vector<56x1xf32>
    %31 = arith.select %29, %5, %30 : vector<56x1xi1>, vector<56x1xf32>
    %cst_10 = arith.constant 0.000000e+00 : f32
    %32 = vector.broadcast %cst_10 : f32 to vector<56x1xf32>
    %33 = arith.select %29, %23, %32 : vector<56x1xi1>, vector<56x1xf32>
    %34 = vector.shape_cast %31 : vector<56x1xf32> to vector<1x56x1xf32>
    %cst_11 = arith.constant dense<0.000000e+00> : vector<1xf32>
    %35 = vector.multi_reduction <add>, %34, %cst_11 [1, 2] : vector<1x56x1xf32> to vector<1xf32>
    %36 = vector.shape_cast %35 : vector<1xf32> to vector<1x1x1xf32>
    %37 = vector.extract %36[0, 0, 0] : f32 from vector<1x1x1xf32>
    %38 = vector.shape_cast %33 : vector<56x1xf32> to vector<1x56x1xf32>
    %cst_12 = arith.constant dense<0.000000e+00> : vector<1xf32>
    %39 = vector.multi_reduction <add>, %38, %cst_12 [1, 2] : vector<1x56x1xf32> to vector<1xf32>
    %40 = vector.shape_cast %39 : vector<1xf32> to vector<1x1x1xf32>
    %41 = vector.extract %40[0, 0, 0] : f32 from vector<1x1x1xf32>
    %42 = tpu.iota {dimensions = array<i32: 1>} : vector<8x128xi32>
    %c0_i32 = arith.constant 0 : i32
    %43 = vector.broadcast %c0_i32 : i32 to vector<8x128xi32>
    %44 = arith.cmpi eq, %42, %43 : vector<8x128xi32>
    %c1_i32 = arith.constant 1 : i32
    %45 = vector.broadcast %c1_i32 : i32 to vector<8x128xi32>
    %46 = arith.cmpi eq, %42, %45 : vector<8x128xi32>
    %cst_13 = arith.constant 0.000000e+00 : f32
    %47 = vector.broadcast %41 : f32 to vector<8x128xf32>
    %48 = vector.broadcast %cst_13 : f32 to vector<8x128xf32>
    %49 = arith.select %46, %47, %48 : vector<8x128xi1>, vector<8x128xf32>
    %50 = vector.broadcast %37 : f32 to vector<8x128xf32>
    %51 = arith.select %44, %50, %49 : vector<8x128xi1>, vector<8x128xf32>
    %52 = vector.shape_cast %51 : vector<8x128xf32> to vector<1x8x128xf32>
    %c0_14 = arith.constant 0 : index
    %c0_15 = arith.constant 0 : index
    %c0_16 = arith.constant 0 : index
    %53 = vector.load %arg3[%c0_14, %c0_15, %c0_16] : memref<1x8x128xf32, #tpu.memory_space<vmem>>, vector<1x8x128xf32>
    tpu.vector_store %arg3[%c0_14, %c0_15, %c0_16], %52 {strides = array<i32>} : memref<1x8x128xf32, #tpu.memory_space<vmem>>, vector<1x8x128xf32>,
    return
  }
  func.func @transform_0(%arg0: i32) -> (i32, i32) {
    %c0_i32 = arith.constant 0 : i32
    %c0_i32_0 = arith.constant 0 : i32
    return %arg0, %c0_i32 : i32, i32
  }
  func.func @transform_1(%arg0: i32) -> (i32, i32) {
    %c0_i32 = arith.constant 0 : i32
    %c0_i32_0 = arith.constant 0 : i32
    return %arg0, %c0_i32 : i32, i32
  }
  func.func @transform_2(%arg0: i32) -> (i32, i32, i32) {
    %c0_i32 = arith.constant 0 : i32
    %c0_i32_0 = arith.constant 0 : i32
    %c0_i32_1 = arith.constant 0 : i32
    return %arg0, %c0_i32, %c0_i32_0 : i32, i32, i32
  }
}

</mosaic_0001>

<bundles_post_ra>
// kernel: tpu_custom_call.1
= control target key start
LH: loop header
LB: loop body
LE: loop exit
PB: predicated region body
PF: predicated region fallthrough
CT: control target
= control target key end

     0   :  { %7 = vsyncpa [#allocation3], 0  ;;  %s1326_s0 = inlined_call_operand.hbm [shape: f32[100,256], index: 0, kind: input, shape index: {}]   ;;  %s1327_s1 = inlined_call_operand.hbm [shape: f32[100,256], index: 1, kind: input, shape index: {}]   ;;  %s1328_s2 = inlined_call_operand.hbm [shape: f32[2,8,128], index: 2, kind: output, shape index: {}]  }
   0x1   :  { %9 = vsyncpa [#allocation3 + $0x1], 0 }
   0x2   :  { %10 = vsyncpa [#allocation6], 0 }
   0x3   :  { %12 = vsyncpa [#allocation6 + $0x1], 0 }
   0x4   :  { %13 = vsyncpa [#allocation4], 0 }
   0x5   :  { %15 = vsyncpa [#allocation4 + $0x1], 0  ;;  %s894_s9 = smov 0   ;;  %s896_s10 = smov 0  }
   0x6   :  { %s898_s11 = smov 0   ;;  %s900_s12 = smov 0  }
   0x7 LB: > { %s915_s13 = sadd.s32 4294967295, %s870_s12   ;;  %s653_s14 = sadd.s32 4294967294, %s870_s12   ;;  %s870_s12 = sphi %s900_s12, %s1341_s12   ;;  %s866_s11 = sphi %s898_s11, %s1340_s11   ;;  %s862_s10 = sphi %s896_s10, %s1339_s10   ;;  %s858_s9 = sphi %s894_s9, %s1338_s9  }
   0x8   : > { %s919_s15 = sadd.s32 1, %s870_s12   ;;  %s28_s16 = sadd.s32 1, %s866_s11 }
   0x9   : > { %s25_s17 = ssub.s32 %s870_s12, %s919_s15  ;;  %p35_p0 = scmp.ne.s32.totalorder %s866_s11, %s862_s10 }
   0xa   : > { %p26_p1 = scmp.eq.s32.totalorder %s25_s17, 0  ;;  %p36_p2 = scmp.eq.s32.totalorder %s870_s12, 0 }
   0xb   : > { %p41_p3 = scmp.ne.s32.totalorder %s862_s10, %s858_s9  ;;  %p42_p4 = scmp.eq.s32.totalorder %s915_s13, 0 }
   0xc   : > { %s931_s18 = scalar_select %p26_p1, %s866_s11, %s28_s16  }
   0xd   : > { %p933_p5 = por %p36_p2, %p35_p0  ;;  %p937_p6 = por %p42_p4, %p41_p3 }
   0xe   : > { %p91_p7 = scmp.eq.s32.totalorder %s915_s13, 1  ;;  %p97_p8 = scmp.eq.s32.totalorder %s653_s14, 1 }
   0xf   : > { %p1329_p11 = scmp.ge.s32.totalorder %s870_s12, 2 }
  0x10   : > { %p942_p9 = por %p91_p7, %p35_p0  ;;  %p946_p10 = por %p97_p8, %p41_p3 }
  0x11   : > { %113 = sbr.rel (%p1329_p11) target bundleno = 90 (0x5a), region = 16 }
  0x12   : > { %s1333_s21 = scalar_select %p942_p9, 1, 0 }
  0x13   : > { %s1334_s22 = scalar_select %p946_p10, 1, 0 }
  0x16   : > { %116 = sbr.rel (!%p933_p5) target bundleno = 56 (0x38), region = 20  ;;  %s117_s23 = sand.u32 (%p933_p5), 1, %s866_s11  }
  0x17   : > { %s122_s24 = smul.u32 (%p933_p5), 7, %s870_s12  ;;  %s960_s29 = scalar_lea.sflag (%p933_p5), [#allocation3], %s117_s23 }
  0x18   : > { %s684_s25 = smul.u32 (%p933_p5), 112, %s117_s23 }
  0x19   : > { %s123_s26 = ssub.s32 (%p933_p5), 13, %s122_s24 }
  0x1a   : > { %p124_p12 = scmp.lt.s32.totalorder (%p933_p5), %s123_s26, 7  ;;  %s121_s30 = scalar_lea.vmem (%p933_p5), [#allocation2], %s684_s25 }
  0x1c   : > { %s1343_s26 = smov (!%p124_p12, %s123_s26), 7 }
  0x1d   : > { %s957_s27 = sshll.u32 %s1343_s26, 8 }
  0x1e   : > { %s129_s28 = ssub.s32 1792, %s957_s27 }
  0x1f   : > { %130 = vsyncadd %s960_s29, %s129_s28  ;;  %p658_p13 = scmp.ne.s32.totalorder %s957_s27, 0  ;;  %s682_s3 = smul.u32 1792, %s870_s12 }
  0x20   : > { %s136_s4 = sshll.u32 %s121_s30, 4  ;;  %s754_s17 = scalar_lea.hbm %s1326_s0, 3328  ;;  %s970_s4 = int_to_ptr.vmem [resolvable:$true] %s136_s4 }
  0x21   : > { %s968_s7 = scalar_lea.hbm %s1326_s0, %s682_s3 }
  0x22   : > { %s750_s8 = scalar_lea.hbm %s968_s7, %s957_s27  ;;  %p755_p3 = scmp.lt.s32.totalorder %s968_s7, %s1326_s0 }
  0x23   : > { %p751_p0 = scmp.ne.s32.totalorder %s968_s7, %s750_s8  ;;  %p756_p4 = scmp.lt.s32.totalorder %s754_s17, %s750_s8 }
  0x25   : > { %p752_p1 = pnand %p751_p0, %p658_p13  ;;  %p757_p7 = por %p756_p4, %p755_p3 }
  0x27   : > { %p753_p2 = pneg %p752_p1 }
  0x29   : > { %p758_p8 = pnand %p757_p7, %p753_p2 }
  0x2b   : > { %761 = shalt.err (!%p758_p8)
}
  0x2c   : > { %s762_s25 = scalar_lea.vmem %s970_s4, %s957_s27  ;;  %s872_s26 = smov [#allocation2]  }
  0x2d   : > { %p763_p12 = scmp.ne.s32.totalorder %s970_s4, %s762_s25  ;;  %s766_s28 = sshll.u32 %s872_s26, 4  ;;  %s767_s28 = int_to_ptr.vmem [resolvable:$false] %s766_s28 }
  0x2e   : > { %s768_s30 = scalar_lea.vmem %s767_s28, 3584  ;;  %p769_p11 = scmp.lt.s32.totalorder %s970_s4, %s767_s28 }
  0x2f   : > { %p764_p0 = pnand %p763_p12, %p658_p13  ;;  %p770_p10 = scmp.lt.s32.totalorder %s768_s30, %s762_s25 }
  0x31   : > { %p765_p1 = pneg %p764_p0  ;;  %p771_p9 = por %p770_p10, %p769_p11 }
  0x33   : > { %p772_p3 = pnand %p771_p9, %p765_p1 }
  0x35   : > { %775 = shalt.err (!%p772_p3)
}
  0x36   : > { %s873_s3 = smov 256   ;;  %s874_s5 = smov 16  }
  0x37   : > { %142 = dma.hbm_to_vmem [thread:$0]  (%p658_p13), %s968_s7, %s957_s27, %s970_s4, %s960_s29, %s873_s3, %s873_s3, %s874_s5  }
  0x38 PF: > { %145 = sbr.rel (!%p933_p5) target bundleno = 90 (0x5a), region = 24  ;;  %s146_s6 = sand.u32 (%p933_p5), 1, %s866_s11  }
  0x39   : > { %s151_s8 = smul.u32 (%p933_p5), 7, %s870_s12  ;;  %s1003_s24 = scalar_lea.sflag (%p933_p5), [#allocation6], %s146_s6 }
  0x3a   : > { %s685_s14 = smul.u32 (%p933_p5), 112, %s146_s6 }
  0x3b   : > { %s152_s16 = ssub.s32 (%p933_p5), 13, %s151_s8 }
  0x3c   : > { %p153_p9 = scmp.lt.s32.totalorder (%p933_p5), %s152_s16, 7  ;;  %s150_s27 = scalar_lea.vmem (%p933_p5), [#allocation5], %s685_s14 }
  0x3e   : > { %s1345_s16 = smov (!%p153_p9, %s152_s16), 7 }
  0x3f   : > { %s1000_s17 = sshll.u32 %s1345_s16, 8 }
  0x40   : > { %s158_s23 = ssub.s32 1792, %s1000_s17 }
  0x41   : > { %159 = vsyncadd %s1003_s24, %s158_s23  ;;  %p665_p5 = scmp.ne.s32.totalorder %s1000_s17, 0  ;;  %s683_s19 = smul.u32 1792, %s870_s12 }
  0x42   : > { %s165_s29 = sshll.u32 %s150_s27, 4  ;;  %s780_s3 = scalar_lea.hbm %s1327_s1, 3328  ;;  %s1013_s29 = int_to_ptr.vmem [resolvable:$true] %s165_s29 }
  0x43   : > { %s1011_s25 = scalar_lea.hbm %s1327_s1, %s683_s19 }
  0x44   : > { %s776_s26 = scalar_lea.hbm %s1011_s25, %s1000_s17  ;;  %p781_p2 = scmp.lt.s32.totalorder %s1011_s25, %s1327_s1 }
  0x45   : > { %p777_p10 = scmp.ne.s32.totalorder %s1011_s25, %s776_s26  ;;  %p782_p4 = scmp.lt.s32.totalorder %s780_s3, %s776_s26 }
  0x47   : > { %p778_p11 = pnand %p777_p10, %p665_p5  ;;  %p783_p7 = por %p782_p4, %p781_p2 }
  0x49   : > { %p779_p13 = pneg %p778_p11 }
  0x4b   : > { %p784_p8 = pnand %p783_p7, %p779_p13 }
  0x4d   : > { %787 = shalt.err (!%p784_p8)
}
  0x4e   : > { %s788_s8 = scalar_lea.vmem %s1013_s29, %s1000_s17  ;;  %s875_s14 = smov [#allocation5]  }
  0x4f   : > { %p789_p12 = scmp.ne.s32.totalorder %s1013_s29, %s788_s8  ;;  %s792_s16 = sshll.u32 %s875_s14, 4  ;;  %s793_s16 = int_to_ptr.vmem [resolvable:$false] %s792_s16 }
  0x50   : > { %s794_s23 = scalar_lea.vmem %s793_s16, 3584  ;;  %p795_p3 = scmp.lt.s32.totalorder %s1013_s29, %s793_s16 }
  0x51   : > { %p790_p0 = pnand %p789_p12, %p665_p5  ;;  %p796_p9 = scmp.lt.s32.totalorder %s794_s23, %s788_s8 }
  0x53   : > { %p791_p1 = pneg %p790_p0  ;;  %p797_p10 = por %p796_p9, %p795_p3 }
  0x55   : > { %p798_p11 = pnand %p797_p10, %p791_p1 }
  0x57   : > { %801 = shalt.err (!%p798_p11)
}
  0x58   : > { %s876_s27 = smov 256   ;;  %s877_s19 = smov 16  }
  0x59   : > { %171 = dma.hbm_to_vmem [thread:$0]  (%p665_p5), %s1011_s25, %s1000_s17, %s1013_s29, %s1003_s24, %s876_s27, %s876_s27, %s877_s19  }
  0x5a PF: > { %p670_p13 = scmp.ge.s32.totalorder %s870_s12, 1  ;;  %p173_p2 = scmp.lt.s32.totalorder %s870_s12, 3 }
  0x5c   : > { %p174_p4 = pnand %p670_p13, %p173_p2 }
  0x5d   : > { %s1042_s4 = sand.u32 (!%p174_p4), 1, %s862_s10  }
  0x5e   : > { %177 = sbr.rel (%p174_p4) target bundleno = 521 (0x209), region = 28  ;;  %s180_s26 = scalar_lea.sflag (!%p174_p4), [#allocation3], %s1042_s4 }
  0x5f   : > { %s686_s7 = smul.u32 (!%p174_p4), 112, %s1042_s4 }
  0x61   : > { %s1046_s28 = scalar_lea.vmem (!%p174_p4), [#allocation2], %s686_s7 }
  0x63   : > { %845 = dma.done.wait (%p937_p6), %s180_s26, 1792  }
  0x64   : > { %847 = vsyncadd (%p937_p6), %s180_s26, 4294965504  ;;  %s189_s17 = scalar_lea.sflag [#allocation6], %s1042_s4  ;;  %s1053_s24 = scalar_lea.vmem [#allocation5], %s686_s7 }
  0x65   : > { %849 = dma.done.wait (%p937_p6), %s189_s17, 1792  }
  0x66   : > { %851 = vsyncadd (%p937_p6), %s189_s17, 4294965504  ;;  %v1060_v0 = vld [vmem:[%s1053_s24] sm:$0xff]  ;;  %v1063_v1 = vld [vmem:[%s1053_s24 + $0x8] sm:$0xff]  ;;  %s462_s20 = smul.u32 56, %s915_s13  ;;  %vm492_vm3 = vcmask 7168   ;;  %s671_s29 = sshll.u32 %s1042_s4, 3 }
  0x67   : > { %v1066_v2 = vld [vmem:[%s1046_s28] sm:$0xff]  ;;  %v342_v3 = vmul.f32 %v1060_v0, %v1060_v0  ;;  %v343_v4 = vmul.f32 %v1063_v1, %v1063_v1  ;;  %v1073_v5 = vld [vmem:[%s1046_s28 + $0x8] sm:$0xff]  ;;  %v1078_v7 = vld [vmem:[%s1053_s24 + $0x10] sm:$0xff]  ;;  %s673_s25 = sshll.u32 %s915_s13, 7  ;;  %s217_s3 = scalar_lea.vmem [#allocation7], %s671_s29 }
  0x68   : > { %v307_v6 = vmul.f32 %v1066_v2, %v1066_v2  ;;  %v1081_v8 = vld [vmem:[%s1053_s24 + $0x18] sm:$0xff]  ;;  %v308_v9 = vmul.f32 %v1073_v5, %v1073_v5  ;;  %v344_v10 = vmul.f32 %v1078_v7, %v1078_v7  ;;  %v1090_v12 = vld [vmem:[%s1046_s28 + $0x10] sm:$0xff]  ;;  %v1096_v14 = vld [vmem:[%s1053_s24 + $0x20] sm:$0xff]  ;;  %s560_s5 = sshll.u32 %s217_s3, 4  ;;  %s1289_s16 = scalar_lea.hbm %s1328_s2, %s673_s25  ;;  %s561_s5 = int_to_ptr.vmem [resolvable:$true] %s560_s5 }
  0x69   : > { %v345_v11 = vmul.f32 %v1081_v8, %v1081_v8  ;;  %v1093_v13 = vld [vmem:[%s1046_s28 + $0x18] sm:$0xff]  ;;  %v356_v15 = vadd.f32 %v343_v4, %v342_v3  ;;  %v309_v16 = vmul.f32 %v1090_v12, %v1090_v12  ;;  %v1103_v18 = vld [vmem:[%s1053_s24 + $0x28] sm:$0xff]  ;;  %v1106_v19 = vld [vmem:[%s1046_s28 + $0x20] sm:$0xff]  ;;  %v346_v23 = vmul.f32 %v1096_v14, %v1096_v14  ;;  %s547_s23 = scalar_lea.sflag [#allocation4], %s1042_s4  ;;  %s802_s13 = scalar_lea.vmem %s561_s5, 128 }
  0x6a   : > { %v310_v17 = vmul.f32 %v1093_v13, %v1093_v13  ;;  %v1109_v20 = vld [vmem:[%s1046_s28 + $0x28] sm:$0xff]  ;;  %v321_v21 = vadd.f32 %v308_v9, %v307_v6  ;;  %v347_v24 = vmul.f32 %v1103_v18, %v1103_v18  ;;  %v311_v26 = vmul.f32 %v1106_v19, %v1106_v19  ;;  %v1120_v28 = vld [vmem:[%s1053_s24 + $0x30] sm:$0xff]  ;;  %v1123_v29 = vld [vmem:[%s1053_s24 + $0x38] sm:$0xff]  ;;  %p803_p6 = scmp.ne.s32.totalorder %s561_s5, %s802_s13  ;;  %p1335_p5 = scmp.ne.s32.totalorder %s1333_s21, 0 }
  0x6b   : > { %357 = vadd.xlane.f32.xlu1 %v356_v15  ;;  %v359_v22 = vadd.f32 %v345_v11, %v344_v10  ;;  %v312_v27 = vmul.f32 %v1109_v20, %v1109_v20  ;;  %v1126_v30 = vld [vmem:[%s1046_s28 + $0x30] sm:$0xff]  ;;  %v1129_v31 = vld [vmem:[%s1046_s28 + $0x38] sm:$0xff]  ;;  %v348_v33 = vmul.f32 %v1120_v28, %v1120_v28  ;;  %v349_v34 = vmul.f32 %v1123_v29, %v1123_v29  ;;  %v1140_v38 = vld [vmem:[%s1053_s24 + $0x40] sm:$0xff]  ;;  %s878_s27 = smov [#allocation7]  }
  0x6c   : > { %322 = vadd.xlane.f32.xlu0 %v321_v21  ;;  %v324_v25 = vadd.f32 %v310_v17, %v309_v16  ;;  %v362_v32 = vadd.f32 %v347_v24, %v346_v23  ;;  %v313_v36 = vmul.f32 %v1126_v30, %v1126_v30  ;;  %v314_v37 = vmul.f32 %v1129_v31, %v1129_v31  ;;  %v1143_v39 = vld [vmem:[%s1053_s24 + $0x48] sm:$0xff]  ;;  %v1146_v40 = vld [vmem:[%s1046_s28 + $0x40] sm:$0xff]  ;;  %v1160_v48 = vld [vmem:[%s1053_s24 + $0x50] sm:$0xff]  ;;  %p804_p7 = pnand %p803_p6, %p1335_p5  ;;  %s806_s19 = sshll.u32 %s878_s27, 4  ;;  %s807_s19 = int_to_ptr.vmem [resolvable:$false] %s806_s19 }
  0x6d   : > { %v327_v35 = vadd.f32 %v312_v27, %v311_v26  ;;  %v1149_v41 = vld [vmem:[%s1046_s28 + $0x48] sm:$0xff]  ;;  %v365_v42 = vadd.f32 %v349_v34, %v348_v33  ;;  %v350_v43 = vmul.f32 %v1140_v38, %v1140_v38  ;;  %v351_v44 = vmul.f32 %v1143_v39, %v1143_v39  ;;  %v1163_v49 = vld [vmem:[%s1053_s24 + $0x58] sm:$0xff]  ;;  %v1166_v50 = vld [vmem:[%s1046_s28 + $0x50] sm:$0xff]  ;;  %s808_s7 = scalar_lea.vmem %s807_s19, 256  ;;  %p809_p12 = scmp.lt.s32.totalorder %s561_s5, %s807_s19 }
  0x6e   : > { %v330_v45 = vadd.f32 %v314_v37, %v313_v36  ;;  %v315_v46 = vmul.f32 %v1146_v40, %v1146_v40  ;;  %v316_v47 = vmul.f32 %v1149_v41, %v1149_v41  ;;  %v1169_v51 = vld [vmem:[%s1046_s28 + $0x58] sm:$0xff]  ;;  %v352_v53 = vmul.f32 %v1160_v48, %v1160_v48  ;;  %v1180_v58 = vld [vmem:[%s1053_s24 + $0x60] sm:$0xff]  ;;  %v1183_v59 = vld [vmem:[%s1053_s24 + $0x68] sm:$0xff]  ;;  %p805_p8 = pneg %p804_p7  ;;  %p810_p0 = scmp.lt.s32.totalorder %s808_s7, %s802_s13 }
  0x6f   : > { %360 = vadd.xlane.f32.xlu1 %v359_v22  ;;  %v368_v52 = vadd.f32 %v351_v44, %v350_v43  ;;  %v353_v54 = vmul.f32 %v1163_v49, %v1163_v49  ;;  %v317_v56 = vmul.f32 %v1166_v50, %v1166_v50  ;;  %v318_v57 = vmul.f32 %v1169_v51, %v1169_v51  ;;  %v1186_v60 = vld [vmem:[%s1046_s28 + $0x60] sm:$0xff]  ;;  %v1189_v61 = vld [vmem:[%s1046_s28 + $0x68] sm:$0xff] }
  0x70   : > { %325 = vadd.xlane.f32.xlu0 %v324_v25  ;;  %v333_v55 = vadd.f32 %v316_v47, %v315_v46  ;;  %v354_v63 = vmul.f32 %v1180_v58, %v1180_v58  ;;  %v355_v3 = vmul.f32 %v1183_v59, %v1183_v59  ;;  %v319_v6 = vmul.f32 %v1186_v60, %v1186_v60  ;;  %p811_p1 = por %p810_p0, %p809_p12 }
  0x71   : > { %v371_v62 = vadd.f32 %v353_v54, %v352_v53  ;;  %v336_v4 = vadd.f32 %v318_v57, %v317_v56  ;;  %v320_v9 = vmul.f32 %v1189_v61, %v1189_v61  ;;  %v379_v10 = vmul.f32 %v1078_v7, %v1090_v12 }
  0x72   : > { %v377_v11 = vmul.f32 %v1060_v0, %v1066_v2  ;;  %v378_v15 = vmul.f32 %v1063_v1, %v1073_v5  ;;  %v374_v16 = vadd.f32 %v355_v3, %v354_v63  ;;  %v380_v17 = vmul.f32 %v1081_v8, %v1093_v13  ;;  %p812_p3 = pnand %p811_p1, %p805_p8 }
  0x73   : > { %363 = vadd.xlane.f32.xlu1 %v362_v32  ;;  %v258_v21 = vsub.f32 %v1066_v2, %v1060_v0  ;;  %v259_v22 = vsub.f32 %v1073_v5, %v1063_v1  ;;  %v339_v23 = vadd.f32 %v320_v9, %v319_v6  ;;  %v381_v32 = vmul.f32 %v1096_v14, %v1106_v19 }
  0x74   : > { %328 = vadd.xlane.f32.xlu0 %v327_v35  ;;  %v394_v24 = vadd.f32 %v380_v17, %v379_v10  ;;  %v391_v25 = vadd.f32 %v378_v15, %v377_v11  ;;  %v382_v33 = vmul.f32 %v1103_v18, %v1109_v20  ;;  %v260_v0 = vsub.f32 %v1090_v12, %v1078_v7 }
  0x75   : > { %v272_v26 = vmul.f32 %v258_v21, %v258_v21  ;;  %v273_v27 = vmul.f32 %v259_v22, %v259_v22  ;;  %v261_v1 = vsub.f32 %v1093_v13, %v1081_v8  ;;  %v383_v5 = vmul.f32 %v1120_v28, %v1126_v30 }
  0x76   : > { %v384_v34 = vmul.f32 %v1123_v29, %v1129_v31  ;;  %v262_v35 = vsub.f32 %v1106_v19, %v1096_v14  ;;  %v397_v36 = vadd.f32 %v382_v33, %v381_v32  ;;  %v274_v37 = vmul.f32 %v260_v0, %v260_v0 }
  0x77   : > { %366 = vadd.xlane.f32.xlu1 %v365_v42  ;;  %v286_v2 = vadd.f32 %v273_v27, %v272_v26  ;;  %v275_v42 = vmul.f32 %v261_v1, %v261_v1  ;;  %v263_v7 = vsub.f32 %v1109_v20, %v1103_v18  ;;  %v385_v13 = vmul.f32 %v1140_v38, %v1146_v40 }
  0x78   : > { %331 = vadd.xlane.f32.xlu0 %v330_v45  ;;  %v400_v8 = vadd.f32 %v384_v34, %v383_v5  ;;  %v276_v12 = vmul.f32 %v262_v35, %v262_v35  ;;  %v386_v43 = vmul.f32 %v1143_v39, %v1149_v41  ;;  %v264_v14 = vsub.f32 %v1126_v30, %v1120_v28 }
  0x79   : > { %v289_v44 = vadd.f32 %v275_v42, %v274_v37  ;;  %v277_v45 = vmul.f32 %v263_v7, %v263_v7  ;;  %v265_v19 = vsub.f32 %v1129_v31, %v1123_v29  ;;  %v387_v18 = vmul.f32 %v1160_v48, %v1166_v50 }
  0x7a   : > { %v388_v20 = vmul.f32 %v1163_v49, %v1169_v51  ;;  %v266_v46 = vsub.f32 %v1146_v40, %v1140_v38  ;;  %v403_v47 = vadd.f32 %v386_v43, %v385_v13  ;;  %v278_v53 = vmul.f32 %v264_v14, %v264_v14 }
  0x7b   : > { %369 = vadd.xlane.f32.xlu1 %v368_v52  ;;  %v292_v52 = vadd.f32 %v277_v45, %v276_v12  ;;  %v279_v54 = vmul.f32 %v265_v19, %v265_v19  ;;  %v267_v28 = vsub.f32 %v1149_v41, %v1143_v39  ;;  %v389_v31 = vmul.f32 %v1180_v58, %v1186_v60 }
  0x7c   : > { %334 = vadd.xlane.f32.xlu0 %v333_v55  ;;  %v406_v30 = vadd.f32 %v388_v20, %v387_v18  ;;  %v280_v29 = vmul.f32 %v266_v46, %v266_v46  ;;  %v390_v55 = vmul.f32 %v1183_v59, %v1189_v61  ;;  %v270_v38 = vsub.f32 %v1186_v60, %v1180_v58 }
  0x7d   : > { %v271_v40 = vsub.f32 %v1189_v61, %v1183_v59  ;;  %v295_v56 = vadd.f32 %v279_v54, %v278_v53  ;;  %v281_v57 = vmul.f32 %v267_v28, %v267_v28  ;;  %v268_v39 = vsub.f32 %v1166_v50, %v1160_v48 }
  0x7e   : > { %v269_v41 = vsub.f32 %v1169_v51, %v1163_v49  ;;  %v284_v63 = vmul.f32 %v270_v38, %v270_v38  ;;  %v454_v35 = vlaneseq  ;;  %v463_v46 = vstv %s462_s20 }
  0x7f   : > { %372 = vadd.xlane.f32.xlu1 %v371_v62  ;;  %v409_v62 = vadd.f32 %v390_v55, %v389_v31  ;;  %v285_v3 = vmul.f32 %v271_v40, %v271_v40  ;;  %v282_v6 = vmul.f32 %v268_v39, %v268_v39 }
  0x80   : > { %337 = vadd.xlane.f32.xlu0 %v336_v4  ;;  %v298_v4 = vadd.f32 %v281_v57, %v280_v29  ;;  %v283_v58 = vmul.f32 %v269_v41, %v269_v41  ;;  %v455_v12 = vshrl.u32 %v454_v35, 7 }
  0x81   : > { %v304_v60 = vadd.f32 %v285_v3, %v284_v63 }
  0x82   : > { %v301_v59 = vadd.f32 %v283_v58, %v282_v6  ;;  %v456_v19 = vadd.s32 8, %v455_v12  ;;  %v458_v55 = vadd.s32 24, %v455_v12 }
  0x83   : > { %375 = vadd.xlane.f32.xlu1 %v374_v16 }
  0x84   : > { %340 = vadd.xlane.f32.xlu0 %v339_v23  ;;  %v465_v31 = vadd.s32 %v463_v46, %v456_v19 }
  0x86   : > { %vm472_vm1 = vcmp.lt.s32.totalorder %v465_v31, 100 }
  0x87   : > { %395 = vadd.xlane.f32.xlu1 %v394_v24 }
  0x88   : > { %392 = vadd.xlane.f32.xlu0 %v391_v25 }
  0x8b   : > { %287 = vadd.xlane.f32.xlu1 %v286_v2 }
  0x8c   : > { %398 = vadd.xlane.f32.xlu0 %v397_v36 }
  0x8f   : > { %401 = vadd.xlane.f32.xlu1 %v400_v8 }
  0x90   : > { %290 = vadd.xlane.f32.xlu0 %v289_v44 }
  0x93   : > { %404 = vadd.xlane.f32.xlu1 %v403_v47 }
  0x94   : > { %293 = vadd.xlane.f32.xlu0 %v292_v52  ;;  %v457_v52 = vadd.s32 16, %v455_v12 }
  0x96   : > { %v466_v39 = vadd.s32 %v463_v46, %v457_v52 }
  0x97   : > { %407 = vadd.xlane.f32.xlu1 %v406_v30  ;;  %v464_v30 = vadd.s32 %v463_v46, %v455_v12 }
  0x98   : > { %296 = vadd.xlane.f32.xlu0 %v295_v56  ;;  %v459_v56 = vadd.s32 32, %v455_v12  ;;  %vm473_vm2 = vcmp.lt.s32.totalorder %v466_v39, 100 }
  0x99   : > { %vm471_vm0 = vcmp.lt.s32.totalorder %v464_v30, 100 }
  0x9b   : > { %410 = vadd.xlane.f32.xlu1 %v409_v62 }
  0x9c   : > { %299 = vadd.xlane.f32.xlu0 %v298_v4  ;;  %v467_v4 = vadd.s32 %v463_v46, %v458_v55 }
  0x9e   : > { %vm474_vm4 = vcmp.lt.s32.totalorder %v467_v4, 100 }
  0x9f   : > { %305 = vadd.xlane.f32.xlu1 %v304_v60 }
  0xa0   : > { %302 = vadd.xlane.f32.xlu0 %v301_v59  ;;  %v468_v59 = vadd.s32 %v463_v46, %v459_v56 }
  0xa2   : > { %vm475_vm5 = vcmp.lt.s32.totalorder %v468_v59, 100 }
  0xf4   : > { %v358_v61 = vpop.xlane.xlu1 %357 }
  0xf5   : > { %v323_v9 = vpop.xlane.xlu0 %322  ;;  %v419_v10 = vadd.f32 1e-12, %v358_v61  ;;  %v460_v61 = vadd.s32 40, %v455_v12 }
  0xf6   : > { %v412_v49 = vadd.f32 1e-12, %v323_v9 }
  0xf8   : > { %v361_v48 = vpop.xlane.xlu1 %360  ;;  %v426_v17 = vmul.f32 %v419_v10, %v412_v49 }
  0xf9   : > { %v326_v50 = vpop.xlane.xlu0 %325  ;;  %v420_v11 = vadd.f32 1e-12, %v361_v48 }
  0xfa   : > { %v413_v15 = vadd.f32 1e-12, %v326_v50  ;;  %736 = vrsqrt.f32 %v426_v17 }
  0xfc   : > { %v364_v51 = vpop.xlane.xlu1 %363  ;;  %v427_v24 = vmul.f32 %v420_v11, %v413_v15 }
  0xfd   : > { %v329_v16 = vpop.xlane.xlu0 %328  ;;  %v421_v21 = vadd.f32 1e-12, %v364_v51 }
  0xfe   : > { %v414_v22 = vadd.f32 1e-12, %v329_v16  ;;  %738 = vrsqrt.f32 %v427_v24  ;;  %v469_v16 = vadd.s32 %v463_v46, %v460_v61 }
 0x100   : > { %v367_v23 = vpop.xlane.xlu1 %366  ;;  %v428_v32 = vmul.f32 %v421_v21, %v414_v22  ;;  %vm476_vm6 = vcmp.lt.s32.totalorder %v469_v16, 100 }
 0x101   : > { %v332_v25 = vpop.xlane.xlu0 %331  ;;  %v422_v26 = vadd.f32 1e-12, %v367_v23  ;;  %v461_v23 = vadd.s32 48, %v455_v12 }
 0x102   : > { %v415_v27 = vadd.f32 1e-12, %v332_v25  ;;  %740 = vrsqrt.f32 %v428_v32 }
 0x104   : > { %v370_v33 = vpop.xlane.xlu1 %369  ;;  %v429_v1 = vmul.f32 %v422_v26, %v415_v27 }
 0x105   : > { %v335_v0 = vpop.xlane.xlu0 %334  ;;  %v423_v2 = vadd.f32 1e-12, %v370_v33 }
 0x106   : > { %v416_v5 = vadd.f32 1e-12, %v335_v0  ;;  %742 = vrsqrt.f32 %v429_v1 }
 0x107   : > { %v737_v18 = vpop.eup %736 }
 0x108   : > { %v373_v34 = vpop.xlane.xlu1 %372  ;;  %v430_v37 = vmul.f32 %v423_v2, %v416_v5 }
 0x109   : > { %v338_v36 = vpop.xlane.xlu0 %337  ;;  %v424_v42 = vadd.f32 1e-12, %v373_v34 }
 0x10a   : > { %v417_v7 = vadd.f32 1e-12, %v338_v36  ;;  %744 = vrsqrt.f32 %v430_v37 }
 0x10b   : > { %v739_v47 = vpop.eup %738 }
 0x10c   : > { %v376_v8 = vpop.xlane.xlu1 %375  ;;  %v431_v43 = vmul.f32 %v424_v42, %v417_v7  ;;  %v470_v7 = vadd.s32 %v463_v46, %v461_v23  ;;  %v538_v23 = vand.u32 127, %v454_v35 }
 0x10d   : > { %v341_v13 = vpop.xlane.xlu0 %340  ;;  %v425_v44 = vadd.f32 1e-12, %v376_v8 }
 0x10e   : > { %v418_v45 = vadd.f32 1e-12, %v341_v13  ;;  %746 = vrsqrt.f32 %v431_v43  ;;  %vm477_vm7 = vcmp.lt.s32.totalorder %v470_v7, 100  ;;  %vm540_vm8 = vcmp.eq.s32.totalorder %v538_v23, 1 }
 0x10f   : > { %v741_v38 = vpop.eup %740  ;;  %vm539_vm9 = vcmp.eq.s32.totalorder %v538_v23, 0 }
 0x110   : > { %v396_v14 = vpop.xlane.xlu1 %395  ;;  %v432_v53 = vmul.f32 %v425_v44, %v418_v45 }
 0x111   : > { %v393_v20 = vpop.xlane.xlu0 %392  ;;  %v441_v54 = vmul.f32 %v739_v47, %v396_v14 }
 0x112   : > { %v440_v28 = vmul.f32 %v737_v18, %v393_v20  ;;  %748 = vrsqrt.f32 %v432_v53 }
 0x113   : > { %v448_v41 = vsub.f32 1.0, %v441_v54  ;;  %v743_v63 = vpop.eup %742 }
 0x114   : > { %v288_v29 = vpop.xlane.xlu1 %287  ;;  %v447_v62 = vsub.f32 1.0, %v440_v28 }
 0x115   : > { %v399_v40 = vpop.xlane.xlu0 %398  ;;  %v486_v48 = vsel %vm472_vm1, %v448_v41, 0.0  ;;  %v478_v27 = vsel %vm471_vm0, %v288_v29, 0.0 }
 0x116   : > { %v442_v57 = vmul.f32 %v741_v38, %v399_v40  ;;  %v485_v9 = vsel %vm471_vm0, %v447_v62, 0.0  ;;  %v516_v21 = vsel %vm492_vm3, %v486_v48, 0.0  ;;  %v493_v8 = vsel %vm492_vm3, %v478_v27, 0.0 }
 0x117   : > { %v745_v10 = vpop.eup %744  ;;  %v515_v17 = vsel %vm492_vm3, %v485_v9, 0.0 }
 0x118   : > { %v402_v3 = vpop.xlane.xlu1 %401  ;;  %v449_v6 = vsub.f32 1.0, %v442_v57  ;;  %v517_v1 = vadd.f32 %v516_v21, %v515_v17 }
 0x119   : > { %v291_v58 = vpop.xlane.xlu0 %290  ;;  %v443_v60 = vmul.f32 %v743_v63, %v402_v3 }
 0x11a   : > { %v487_v51 = vsel %vm473_vm2, %v449_v6, 0.0  ;;  %v479_v22 = vsel %vm472_vm1, %v291_v58, 0.0 }
 0x11b   : > { %v450_v50 = vsub.f32 1.0, %v443_v60  ;;  %v747_v26 = vpop.eup %746  ;;  %v518_v32 = vsel %vm492_vm3, %v487_v51, 0.0  ;;  %v494_v2 = vsel %vm492_vm3, %v479_v22, 0.0 }
 0x11c   : > { %v405_v49 = vpop.xlane.xlu1 %404  ;;  %v519_v12 = vadd.f32 %v518_v32, %v517_v1  ;;  %v495_v45 = vadd.f32 %v494_v2, %v493_v8 }
 0x11d   : > { %v294_v11 = vpop.xlane.xlu0 %293  ;;  %v444_v15 = vmul.f32 %v745_v10, %v405_v49  ;;  %v488_v25 = vsel %vm474_vm4, %v450_v50, 0.0 }
 0x11e   : > { %v480_v33 = vsel %vm473_vm2, %v294_v11, 0.0  ;;  %v520_v42 = vsel %vm492_vm3, %v488_v25, 0.0 }
 0x11f   : > { %v451_v24 = vsub.f32 1.0, %v444_v15  ;;  %v496_v13 = vsel %vm492_vm3, %v480_v33, 0.0  ;;  %v749_v44 = vpop.eup %748  ;;  %v521_v20 = vadd.f32 %v520_v42, %v519_v12 }
 0x120   : > { %v408_v0 = vpop.xlane.xlu1 %407  ;;  %v497_v54 = vadd.f32 %v496_v13, %v495_v45 }
 0x121   : > { %v297_v5 = vpop.xlane.xlu0 %296  ;;  %v445_v34 = vmul.f32 %v747_v26, %v408_v0  ;;  %v489_v36 = vsel %vm475_vm5, %v451_v24, 0.0 }
 0x122   : > { %v481_v37 = vsel %vm474_vm4, %v297_v5, 0.0  ;;  %v522_v14 = vsel %vm492_vm3, %v489_v36, 0.0 }
 0x123   : > { %v452_v43 = vsub.f32 1.0, %v445_v34  ;;  %v498_v18 = vsel %vm492_vm3, %v481_v37, 0.0  ;;  %v523_v29 = vadd.f32 %v522_v14, %v521_v20 }
 0x124   : > { %v411_v19 = vpop.xlane.xlu1 %410  ;;  %v499_v55 = vadd.f32 %v498_v18, %v497_v54 }
 0x125   : > { %v300_v47 = vpop.xlane.xlu0 %299  ;;  %v446_v52 = vmul.f32 %v749_v44, %v411_v19  ;;  %v490_v53 = vsel %vm476_vm6, %v452_v43, 0.0 }
 0x126   : > { %v482_v46 = vsel %vm475_vm5, %v300_v47, 0.0  ;;  %v524_v28 = vsel %vm492_vm3, %v490_v53, 0.0 }
 0x127   : > { %v500_v30 = vsel %vm492_vm3, %v482_v46, 0.0  ;;  %v453_v31 = vsub.f32 1.0, %v446_v52  ;;  %v525_v39 = vadd.f32 %v524_v28, %v523_v29 }
 0x128   : > { %v306_v38 = vpop.xlane.xlu1 %305  ;;  %v501_v41 = vadd.f32 %v500_v30, %v499_v55 }
 0x129   : > { %v303_v40 = vpop.xlane.xlu0 %302  ;;  %v491_v56 = vsel %vm477_vm7, %v453_v31, 0.0  ;;  %v484_v57 = vsel %vm477_vm7, %v306_v38, 0.0 }
 0x12a   : > { %v483_v62 = vsel %vm476_vm6, %v303_v40, 0.0  ;;  %v526_v63 = vsel %vm492_vm3, %v491_v56, 0.0  ;;  %v504_v4 = vsel %vm492_vm3, %v484_v57, 0.0 }
 0x12b   : > { %v502_v3 = vsel %vm492_vm3, %v483_v62, 0.0  ;;  %v527_v6 = vadd.f32 %v526_v63, %v525_v39 }
 0x12c   : > { %v503_v58 = vadd.f32 %v502_v3, %v501_v41 }
 0x12d   : > { %528 = vadd.xlane.f32.xlu1 %v527_v6 }
 0x12e   : > { %v505_v60 = vadd.f32 %v504_v4, %v503_v58 }
 0x130   : > { %506 = vadd.xlane.f32.xlu0 %v505_v60 }
 0x1b6   : > { %v529_v59 = vpop.xlane.xlu1 %528 }
 0x1b7   : > { %v530_v61 = vrot.slane %v529_v59, 4 }
 0x1b9   : > { %v531_v9 = vadd.f32 %v530_v61, %v529_v59  ;;  %v507_v48 = vpop.xlane.xlu0 %506 }
 0x1ba   : > { %v508_v50 = vrot.slane %v507_v48, 4 }
 0x1bb   : > { %v532_v10 = vrot.slane %v531_v9, 2 }
 0x1bc   : > { %v509_v49 = vadd.f32 %v508_v50, %v507_v48 }
 0x1bd   : > { %v533_v51 = vadd.f32 %v532_v10, %v531_v9 }
 0x1be   : > { %v510_v11 = vrot.slane %v509_v49, 2 }
 0x1bf   : > { %v534_v16 = vrot.slane %v533_v51, 1 }
 0x1c0   : > { %v511_v15 = vadd.f32 %v510_v11, %v509_v49 }
 0x1c1   : > { %v535_v22 = vadd.f32 %v534_v16, %v533_v51 }
 0x1c2   : > { %v512_v17 = vrot.slane %v511_v15, 1 }
 0x1c4   : > { %v513_v21 = vadd.f32 %v512_v17, %v511_v15 }
 0x1c6   : > { %687 = vpush %v513_v21 }
 0x1c7   : > { %689 = vpush %v535_v22 }
 0x1f7   : > { %s688_s30 = spop %687 }
 0x1f8   : > { %v543_v24 = vstv %s688_s30  ;;  %s690_s6 = spop %689 }
 0x1f9   : > { %v541_v25 = vstv %s690_s6 }
 0x1fa   : > { %v542_v26 = vsel %vm540_vm8, %v541_v25, 0.0 }
 0x1fb   : > { %v544_v27 = vsel %vm539_vm9, %v543_v24, %v542_v26 }
 0x1fc   : > { %545 = vst [vmem:[%s217_s3] sm:$0xff] %v544_v27 }
 0x1fd   : > { %815 = shalt.err (!%p812_p3)
}
 0x1fe   : > { %s816_s26 = scalar_lea.hbm %s1289_s16, 128  ;;  %s820_s17 = scalar_lea.hbm %s1328_s2, 256 }
 0x1ff   : > { %p817_p9 = scmp.ne.s32.totalorder %s1289_s16, %s816_s26  ;;  %p821_p13 = scmp.lt.s32.totalorder %s1289_s16, %s1328_s2 }
 0x200   : > { %p822_p2 = scmp.lt.s32.totalorder %s820_s17, %s816_s26 }
 0x201   : > { %p818_p10 = pnand %p817_p9, %p1335_p5 }
 0x202   : > { %p823_p4 = por %p822_p2, %p821_p13 }
 0x203   : > { %p819_p11 = pneg %p818_p10 }
 0x205   : > { %p824_p6 = pnand %p823_p4, %p819_p11 }
 0x207   : > { %827 = shalt.err (!%p824_p6)
}
 0x208   : > { %693 = dma.vmem_to_hbm [thread:$0]  (%p1335_p5), %s561_s5, 128, %s1289_s16, %s547_s23  }
 0x209 PF: > { %s572_s29 = sand.u32 1, %s858_s9   ;;  %p1336_p7 = scmp.ne.s32.totalorder %s1334_s22, 0 }
 0x20a   : > { %p1337_p8 = scmp.ge.s32.totalorder %s870_s12, 2  ;;  %s573_s25 = scalar_lea.sflag [#allocation4], %s572_s29 }
 0x20c   : > { %p696_p12 = pnand %p1337_p8, %p1336_p7 }
 0x20e   : > { %p697_p0 = pneg %p696_p12 }
 0x210   : > { %853 = dma.done.wait (%p697_p0), %s573_s25, 128  }
 0x211   : > { %855 = vsyncadd (%p697_p0), %s573_s25, 4294967168  ;;  %p18_p1 = scmp.ge.s32.totalorder %s919_s15, 4   ;;  %s1338_s9 = smov %s862_s10 }
 0x212   : > { %s1339_s10 = smov %s866_s11  ;;  %s1340_s11 = smov %s931_s18 }
 0x213   : > { %s1341_s12 = smov %s919_s15  ;;  %20 = sbr.rel (!%p18_p1) target bundleno = 7 (0x7), region = 86 }
 0x218   :  { %578 = vsyncpa [#allocation3], 1 }
 0x219   :  { %580 = vsyncpa [#allocation3 + $0x1], 1 }
 0x21a   :  { %581 = vsyncpa [#allocation6], 1 }
 0x21b   :  { %583 = vsyncpa [#allocation6 + $0x1], 1 }
 0x21c   :  { %584 = vsyncpa [#allocation4], 1 }
 0x21d   :  { %586 = vsyncpa [#allocation4 + $0x1], 1 }

</bundles_post_ra>
